<compile_context>
chip_gen: v7x
topology: tpu7x:2x2x1
jax: 0.10.0
libtpu: 0.0.40
codegen_flags: <defaults>
</compile_context>

<pallas_src>
import jax
import jax.numpy as jnp
from jax.experimental import pallas as pl
from jax.experimental.pallas import tpu as pltpu


def _round_up(x: int, m: int) -> int:
    return (x + m - 1) // m * m


def fm_kernel(idx_ref, table_aug_ref, w_ref, b_ref, out_ref):
    # idx_ref:       (F, TB)   int32, VMEM -- field-major index tile (batch on lanes)
    # table_aug_ref: (D+1, V)  f32,   VMEM -- [table^T ; sum_D(table^2)], resident
    # w_ref:         (F,)      f32,   SMEM -- Linear weight
    # b_ref:         (1,)      f32,   SMEM -- Linear bias
    # out_ref:       (1, TB)   f32,   VMEM -- lane-dense output tile
    F, TB = idx_ref.shape
    Dp1, V = table_aug_ref.shape
    D = Dp1 - 1

    # (V, 1) iota, broadcast inside the compare -> tiny persistent vreg footprint.
    iota_v = jax.lax.broadcasted_iota(jnp.int32, (V, 1), 0)

    counts_i = jnp.zeros((V, TB), jnp.int32)   # vocab multiplicity per batch column
    lin = jnp.zeros((1, TB), jnp.float32)      # Linear on raw indices-as-float
    for f in range(F):                         # F is small & static
        row = idx_ref[f:f + 1, :]                               # (1, TB) int32
        counts_i = counts_i + (row == iota_v).astype(jnp.int32)  # (V, TB)
        lin = lin + w_ref[f] * row.astype(jnp.float32)           # VPU, scalar from SMEM
    lin = lin + b_ref[0]
    counts = counts_i.astype(jnp.float32)      # single cast after the loop

    # One MXU matmul yields BOTH the field-summed embedding (rows 0..D-1) and the
    # sum-of-squares term (row D, coming from the appended sum_D(table^2) row):
    #   aug[d, b] = sum_v table_aug[d, v] * counts[v, b]
    aug = jnp.dot(table_aug_ref[...], counts,
                  preferred_element_type=jnp.float32)           # (D+1, TB)
    s_t = aug[:D, :]                                            # (D, TB)
    sum_of_square = aug[D:, :]                                  # (1, TB)
    square_of_sum = jnp.sum(s_t * s_t, axis=0, keepdims=True)   # (1, TB)

    out_ref[...] = lin + 0.5 * (square_of_sum - sum_of_square)


def fm_forward(indices, emb_table, lin_w, lin_b, *, tile_b: int = 512):
    """FactorizationMachineModel.forward.

    indices: (B, F) int; emb_table: (V, D) f32; lin_w: (1, F); lin_b: (1, 1).
    Returns (B,) f32 == (linear + fm).squeeze(1).
    """
    B, F = indices.shape
    V, D = emb_table.shape

    # Lane-dense batch tiling (TB multiple of 128). When more than one 128-lane
    # tile of batch exists, cap TB so the grid has >= 2 steps -> the "parallel"
    # axis can shard across both TensorCores on v7x.
    B128 = _round_up(max(B, 1), 128)
    if B128 > 128:
        TB = min(tile_b, _round_up((B128 + 1) // 2, 128))
    else:
        TB = 128
    G = pl.cdiv(B, TB)

    # Field-major layout so batch lands on the lane axis inside the kernel.
    # TODO(synk): for production, supply indices field-major (F, B) upstream to
    # avoid this extra transpose pass over HBM (indices are the only big input).
    idx_t = indices.astype(jnp.int32).T                         # (F, B)

    table_f32 = emb_table.astype(jnp.float32)
    # Augmented transposed table: rows 0..D-1 = table^T, row D = sum_D(table^2).
    table_aug = jnp.concatenate(
        [table_f32.T, jnp.sum(table_f32 * table_f32, axis=1)[None, :]],
        axis=0)                                                 # (D+1, V)

    w = lin_w.reshape(F).astype(jnp.float32)                    # (F,)
    b = lin_b.reshape(1).astype(jnp.float32)                    # (1,)

    out = pl.pallas_call(
        fm_kernel,
        out_shape=jax.ShapeDtypeStruct((1, B), jnp.float32),
        grid=(G,),
        in_specs=[
            pl.BlockSpec((F, TB), lambda i: (0, i)),        # indices: pipelined tiles
            pl.BlockSpec((D + 1, V), lambda i: (0, 0)),     # augmented table: resident
            pl.BlockSpec(memory_space=pltpu.MemorySpace.SMEM),   # linear weight
            pl.BlockSpec(memory_space=pltpu.MemorySpace.SMEM),   # linear bias
        ],
        out_specs=pl.BlockSpec((1, TB), lambda i: (0, i)),
        compiler_params=pltpu.CompilerParams(
            dimension_semantics=("parallel",),
        ),
    )(idx_t, table_aug, w, b)

    return out[0]                                               # (B,)  == .squeeze(1)


def fm_reference(indices, emb_table, lin_w, lin_b):
    x = indices.astype(jnp.float32)
    emb = jnp.take(emb_table, indices, axis=0)
    linear = x @ lin_w.T + lin_b
    s = jnp.sum(emb, axis=1)
    ix = jnp.sum(s * s - jnp.sum(emb * emb, axis=1), axis=1, keepdims=True)
    return (linear + 0.5 * ix)[:, 0]


if __name__ == "__main__":
    # Model config (FactorizationMachineModel(field_dims, embed_dim))
    field_dims = [10, 10, 10, 20]
    num_fields = len(field_dims)       # F = 4
    num_embeddings = field_dims[-1]    # V = 20
    embed_dim = 32                     # D = 32
    batch = 8                          # B = 8

    key = jax.random.PRNGKey(0)
    k_idx, k_emb, k_w, k_b, k_idx2 = jax.random.split(key, 5)

    # Embedding weight: xavier_uniform_ -> U(-a, a), a = sqrt(6 / (V + D))
    xav = (6.0 / (num_embeddings + embed_dim)) ** 0.5
    emb_table = jax.random.uniform(
        k_emb, (num_embeddings, embed_dim), jnp.float32, minval=-xav, maxval=xav)

    # Linear(num_fields, 1) default init: U(-1/sqrt(F), 1/sqrt(F)) for weight & bias
    lim = 1.0 / (num_fields ** 0.5)
    lin_w = jax.random.uniform(k_w, (1, num_fields), jnp.float32, minval=-lim, maxval=lim)
    lin_b = jax.random.uniform(k_b, (1, 1), jnp.float32, minval=-lim, maxval=lim)

    # interaction_pairs: Long tensor (B, F) with valid embedding indices
    indices = jax.random.randint(k_idx, (batch, num_fields), 0, num_embeddings, jnp.int32)

    out = fm_forward(indices, emb_table, lin_w, lin_b)
    jax.block_until_ready(out)
    ref = fm_reference(indices, emb_table, lin_w, lin_b)
    assert out.shape == (batch,)
    assert jnp.allclose(out, ref, rtol=1e-5, atol=1e-5), (out, ref)

    # Ragged multi-tile batch: exercises G >= 2 and the masked final tile.
    batch2 = 300
    indices2 = jax.random.randint(
        k_idx2, (batch2, num_fields), 0, num_embeddings, jnp.int32)
    out2 = fm_forward(indices2, emb_table, lin_w, lin_b)
    jax.block_until_ready(out2)
    ref2 = fm_reference(indices2, emb_table, lin_w, lin_b)
    assert out2.shape == (batch2,)
    assert jnp.allclose(out2, ref2, rtol=1e-5, atol=1e-5)

    print("KERNEL_OK")
</pallas_src>

<mosaic_0001>
module attributes {stable_mosaic.version = 11 : i64} {
  func.func @fm_kernel(%arg0: i32, %arg1: memref<4x128xi32, #tpu.memory_space<vmem>>, %arg2: memref<33x20xf32, #tpu.memory_space<vmem>>, %arg3: memref<4xf32, #tpu.memory_space<smem>>, %arg4: memref<1xf32, #tpu.memory_space<smem>>, %arg5: memref<1x128xf32, #tpu.memory_space<vmem>>) attributes {dimension_semantics = [#tpu.dimension_semantics<parallel>], iteration_bounds = array<i64: 1>, scalar_prefetch = 0 : i64, scratch_operands = 0 : i64, tpu.core_type = #tpu.core_type<tc>, window_params = [{transform_indices = @transform_0, window_bounds = array<i64: 4, 128>}, {pipeline_mode = #tpu.pipeline_mode<synchronous>, transform_indices = @transform_1, window_bounds = array<i64: 33, 20>}, {transform_indices = @transform_2, window_bounds = array<i64: 4>}, {transform_indices = @transform_3, window_bounds = array<i64: 1>}, {transform_indices = @transform_4, window_bounds = array<i64: 1, 128>}]} {
    %0 = tpu.iota {dimensions = array<i32: 0>} : vector<20x1xi32>
    %c0_i32 = arith.constant 0 : i32
    %1 = vector.broadcast %c0_i32 : i32 to vector<20x128xi32>
    %cst = arith.constant 0.000000e+00 : f32
    %2 = vector.broadcast %cst : f32 to vector<1x128xf32>
    %c0 = arith.constant 0 : index
    %c0_0 = arith.constant 0 : index
    %3 = vector.load %arg1[%c0, %c0_0] : memref<4x128xi32, #tpu.memory_space<vmem>>, vector<1x128xi32>
    %4 = vector.broadcast %3 : vector<1x128xi32> to vector<20x128xi32>
    %5 = vector.broadcast %0 : vector<20x1xi32> to vector<20x128xi32>
    %6 = arith.cmpi eq, %4, %5 : vector<20x128xi32>
    %7 = arith.extui %6 : vector<20x128xi1> to vector<20x128xi32>
    %8 = arith.addi %1, %7 : vector<20x128xi32>
    %c0_1 = arith.constant 0 : index
    %9 = memref.load %arg3[%c0_1] : memref<4xf32, #tpu.memory_space<smem>>
    %10 = arith.sitofp %3 : vector<1x128xi32> to vector<1x128xf32>
    %11 = vector.broadcast %9 : f32 to vector<1x128xf32>
    %12 = arith.mulf %11, %10 : vector<1x128xf32>
    %13 = arith.addf %2, %12 : vector<1x128xf32>
    %c1 = arith.constant 1 : index
    %c0_2 = arith.constant 0 : index
    %14 = vector.load %arg1[%c1, %c0_2] : memref<4x128xi32, #tpu.memory_space<vmem>>, vector<1x128xi32>
    %15 = vector.broadcast %14 : vector<1x128xi32> to vector<20x128xi32>
    %16 = vector.broadcast %0 : vector<20x1xi32> to vector<20x128xi32>
    %17 = arith.cmpi eq, %15, %16 : vector<20x128xi32>
    %18 = arith.extui %17 : vector<20x128xi1> to vector<20x128xi32>
    %19 = arith.addi %8, %18 : vector<20x128xi32>
    %c1_3 = arith.constant 1 : index
    %20 = memref.load %arg3[%c1_3] : memref<4xf32, #tpu.memory_space<smem>>
    %21 = arith.sitofp %14 : vector<1x128xi32> to vector<1x128xf32>
    %22 = vector.broadcast %20 : f32 to vector<1x128xf32>
    %23 = arith.mulf %22, %21 : vector<1x128xf32>
    %24 = arith.addf %13, %23 : vector<1x128xf32>
    %c2 = arith.constant 2 : index
    %c0_4 = arith.constant 0 : index
    %25 = vector.load %arg1[%c2, %c0_4] : memref<4x128xi32, #tpu.memory_space<vmem>>, vector<1x128xi32>
    %26 = vector.broadcast %25 : vector<1x128xi32> to vector<20x128xi32>
    %27 = vector.broadcast %0 : vector<20x1xi32> to vector<20x128xi32>
    %28 = arith.cmpi eq, %26, %27 : vector<20x128xi32>
    %29 = arith.extui %28 : vector<20x128xi1> to vector<20x128xi32>
    %30 = arith.addi %19, %29 : vector<20x128xi32>
    %c2_5 = arith.constant 2 : index
    %31 = memref.load %arg3[%c2_5] : memref<4xf32, #tpu.memory_space<smem>>
    %32 = arith.sitofp %25 : vector<1x128xi32> to vector<1x128xf32>
    %33 = vector.broadcast %31 : f32 to vector<1x128xf32>
    %34 = arith.mulf %33, %32 : vector<1x128xf32>
    %35 = arith.addf %24, %34 : vector<1x128xf32>
    %c3 = arith.constant 3 : index
    %c0_6 = arith.constant 0 : index
    %36 = vector.load %arg1[%c3, %c0_6] : memref<4x128xi32, #tpu.memory_space<vmem>>, vector<1x128xi32>
    %37 = vector.broadcast %36 : vector<1x128xi32> to vector<20x128xi32>
    %38 = vector.broadcast %0 : vector<20x1xi32> to vector<20x128xi32>
    %39 = arith.cmpi eq, %37, %38 : vector<20x128xi32>
    %40 = arith.extui %39 : vector<20x128xi1> to vector<20x128xi32>
    %41 = arith.addi %30, %40 : vector<20x128xi32>
    %c3_7 = arith.constant 3 : index
    %42 = memref.load %arg3[%c3_7] : memref<4xf32, #tpu.memory_space<smem>>
    %43 = arith.sitofp %36 : vector<1x128xi32> to vector<1x128xf32>
    %44 = vector.broadcast %42 : f32 to vector<1x128xf32>
    %45 = arith.mulf %44, %43 : vector<1x128xf32>
    %46 = arith.addf %35, %45 : vector<1x128xf32>
    %c0_8 = arith.constant 0 : index
    %47 = memref.load %arg4[%c0_8] : memref<1xf32, #tpu.memory_space<smem>>
    %48 = vector.broadcast %47 : f32 to vector<1x128xf32>
    %49 = arith.addf %46, %48 : vector<1x128xf32>
    %50 = arith.sitofp %41 : vector<20x128xi32> to vector<20x128xf32>
    %c0_9 = arith.constant 0 : index
    %c0_10 = arith.constant 0 : index
    %51 = vector.load %arg2[%c0_9, %c0_10] : memref<33x20xf32, #tpu.memory_space<vmem>>, vector<33x20xf32>
    %cst_11 = arith.constant dense<0.000000e+00> : vector<33x128xf32>
    %52 = tpu.matmul %51, %50, %cst_11 {dimension_numbers = #tpu.dot_dimension_numbers<[1], [0], [0], [1], [0, 0, 1, 1], [], []>} : vector<33x20xf32>, vector<20x128xf32>, vector<33x128xf32> -> vector<33x128xf32>
    %53 = vector.extract_strided_slice %52 {offsets = [0, 0], sizes = [32, 128], strides = [1, 1]} : vector<33x128xf32> to vector<32x128xf32>
    %54 = vector.extract_strided_slice %52 {offsets = [32, 0], sizes = [1, 128], strides = [1, 1]} : vector<33x128xf32> to vector<1x128xf32>
    %55 = arith.mulf %53, %53 : vector<32x128xf32>
    %cst_12 = arith.constant dense<0.000000e+00> : vector<128xf32>
    %56 = vector.multi_reduction <add>, %55, %cst_12 [0] : vector<32x128xf32> to vector<128xf32>
    %57 = vector.shape_cast %56 : vector<128xf32> to vector<1x128xf32>
    %58 = arith.subf %57, %54 : vector<1x128xf32>
    %cst_13 = arith.constant 5.000000e-01 : f32
    %59 = vector.broadcast %cst_13 : f32 to vector<1x128xf32>
    %60 = arith.mulf %59, %58 : vector<1x128xf32>
    %61 = arith.addf %49, %60 : vector<1x128xf32>
    %c0_14 = arith.constant 0 : index
    %c0_15 = arith.constant 0 : index
    %62 = vector.load %arg5[%c0_14, %c0_15] : memref<1x128xf32, #tpu.memory_space<vmem>>, vector<1x128xf32>
    tpu.vector_store %arg5[%c0_14, %c0_15], %61 {strides = array<i32>} : memref<1x128xf32, #tpu.memory_space<vmem>>, vector<1x128xf32>,
    return
  }
  func.func @transform_0(%arg0: i32) -> (i32, i32) {
    %c0_i32 = arith.constant 0 : i32
    %c0_i32_0 = arith.constant 0 : i32
    return %c0_i32, %arg0 : i32, i32
  }
  func.func @transform_1(%arg0: i32) -> (i32, i32) {
    %c0_i32 = arith.constant 0 : i32
    %c0_i32_0 = arith.constant 0 : i32
    %c0_i32_1 = arith.constant 0 : i32
    return %c0_i32, %c0_i32_0 : i32, i32
  }
  func.func @transform_2(%arg0: i32) -> i32 {
    %c0_i32 = arith.constant 0 : i32
    %c0_i32_0 = arith.constant 0 : i32
    return %c0_i32 : i32
  }
  func.func @transform_3(%arg0: i32) -> i32 {
    %c0_i32 = arith.constant 0 : i32
    %c0_i32_0 = arith.constant 0 : i32
    return %c0_i32 : i32
  }
  func.func @transform_4(%arg0: i32) -> (i32, i32) {
    %c0_i32 = arith.constant 0 : i32
    %c0_i32_0 = arith.constant 0 : i32
    return %c0_i32, %arg0 : i32, i32
  }
}

</mosaic_0001>

<bundles_post_ra>
// kernel: tpu_custom_call.1
= control target key start
LH: loop header
LB: loop body
LE: loop exit
PB: predicated region body
PF: predicated region fallthrough
CT: control target
= control target key end

     0   :  { %10 = vsyncpa [#allocation5], 0  ;;  %s455_s0 = inlined_call_operand.vmem [shape: s32[4,8], index: 0, kind: input, shape index: {}]   ;;  %s456_s1 = inlined_call_operand.vmem [shape: f32[33,20], index: 1, kind: input, shape index: {}]   ;;  %s457_s2 = inlined_call_operand.vmem [shape: f32[4], index: 2, kind: input, shape index: {}]   ;;  %s458_s3 = inlined_call_operand.<no memory space> [shape: f32[1], index: 3, kind: input, shape index: {}]   ;;  %s459_s4 = inlined_call_operand.hbm [shape: f32[1,8], index: 4, kind: output, shape index: {}]  }
   0x1   :  { %11 = vsyncpa [#allocation4], 0  ;;  %s22_s17 = sshll.u32 %s457_s2, 4  ;;  %s23_s17 = int_to_ptr.vmem [resolvable:$true] %s22_s17 }
   0x2   :  { %s313_s18 = scalar_lea.vmem %s23_s17, 16  ;;  %p318_p1 = scmp.lt.s32.totalorder %s23_s17, %s23_s17 }
   0x3   :  { %p314_p0 = scmp.ne.s32.totalorder %s23_s17, %s313_s18  ;;  %p319_p2 = scmp.lt.s32.totalorder %s313_s18, %s313_s18 }
   0x5   :  { %p320_p3 = por %p319_p2, %p318_p1 }
   0x7   :  { %p321_p4 = pnand %p320_p3, %p314_p0 }
   0x9   :  { %324 = shalt.err (!%p321_p4)
}
   0xa   :  { %s351_s19 = smov [#allocation3]  }
   0xb   :  { %25 = dma.vmem_to_smem %s23_s17, 16, %s351_s19, [#allocation5]  }
   0xc   :  { %347 = dma.done.wait [#allocation5], 16  }
   0xd   :  { %348 = vsyncadd [#allocation5], 4294967280 }
   0xe   :  { %31 = sfence }
   0xf   :  { %v32_v0 = vlaneseq  ;;  %v352_v1 = vmov 0.0|0.0   ;;  %v388_v3 = vld [vmem:[%s455_s0] sm:$0x1]  ;;  %v393_v4 = vld [vmem:[%s455_s0 + $0x1] sm:$0x1]  ;;  %vm353_vm0 = vmmov 0  }
  0x10   :  { %300 = vmatprep.subr.bf16.mxu0 %v352_v1  ;;  %303 = vmatprep.subr.bf16.mxu1 %v352_v1  ;;  %v398_v5 = vld [vmem:[%s455_s0 + $0x2] sm:$0x1]  ;;  %v354_v6 = vmov 0.0   ;;  %v407_v9 = vld [vmem:[%s455_s0 + $0x3] sm:$0x1]  ;;  %v355_v15 = vmov 0   ;;  %v48_v57 = vcvt.s32.f32 %v388_v3  ;;  %v67_v58 = vcvt.s32.f32 %v393_v4 }
  0x11   :  { %v33_v2 = vshrl.u32 %v32_v0, 7  ;;  %285 = vmatprep.mubr.msk.f32.mxu0 %vm353_vm0, %v354_v6  ;;  %294 = vmatprep.mubr.msk.f32.mxu1 %vm353_vm0, %v354_v6  ;;  %vm136_vm13 = vcmask 1043456   ;;  %v115_v41 = vld [vmem:[%s456_s1] sm:$0xff]  ;;  %vm120_vm14 = vcmask 162816   ;;  %v118_v42 = vld [vmem:[%s456_s1 + $0x18] sm:$0xff]  ;;  %v116_v43 = vld [vmem:[%s456_s1 + $0x8] sm:$0xff] }
  0x12   :  { %v119_v44 = vld [vmem:[%s456_s1 + $0x20] sm:$0x1]  ;;  %v117_v45 = vld [vmem:[%s456_s1 + $0x10] sm:$0xff]  ;;  %s47_s10 = sld [smem:[#allocation3]]  ;;  %s262_s11 = sld [smem:[#allocation3 + $0x1]] }
  0x13   :  { %v34_v7 = vadd.s32 8, %v33_v2  ;;  %v39_v8 = vsub.s32 0, %v33_v2  ;;  %v35_v14 = vadd.s32 16, %v33_v2  ;;  %s263_s12 = sld [smem:[#allocation3 + $0x2]]  ;;  %s264_s1 = sld [smem:[#allocation3 + $0x3]] }
  0x14   :  { %s356_s15 = smov [#allocation6]  }
  0x15   :  { %v40_v10 = vrot.slane %v388_v3, %v39_v8  ;;  %v56_v11 = vrot.slane %v393_v4, %v39_v8  ;;  %v75_v12 = vrot.slane %v398_v5, %v39_v8  ;;  %v94_v13 = vrot.slane %v407_v9, %v39_v8  ;;  %s253_s16 = sshll.u32 %s356_s15, 4  ;;  %s254_s16 = int_to_ptr.vmem [resolvable:$true] %s253_s16 }
  0x16   :  { %v105_v3 = vcvt.s32.f32 %v407_v9  ;;  %s325_s17 = scalar_lea.vmem %s254_s16, 16  ;;  %s329_s18 = scalar_lea.vmem %s254_s16, 32 }
  0x17   :  { %vm41_vm1 = vcmp.eq.s32.totalorder %v40_v10, %v33_v2  ;;  %vm42_vm2 = vcmp.eq.s32.totalorder %v40_v10, %v34_v7  ;;  %vm57_vm3 = vcmp.eq.s32.totalorder %v56_v11, %v33_v2  ;;  %vm58_vm4 = vcmp.eq.s32.totalorder %v56_v11, %v34_v7  ;;  %p326_p5 = scmp.ne.s32.totalorder %s254_s16, %s325_s17  ;;  %p330_p6 = scmp.lt.s32.totalorder %s254_s16, %s254_s16 }
  0x18   :  { %v44_v16 = vsel %vm41_vm1, 1, %v355_v15  ;;  %v45_v17 = vsel %vm42_vm2, 1, %v355_v15  ;;  %v60_v18 = vsel %vm57_vm3, 1, %v355_v15  ;;  %v61_v19 = vsel %vm58_vm4, 1, %v355_v15  ;;  %p331_p7 = scmp.lt.s32.totalorder %s329_s18, %s325_s17 }
  0x19   :  { %v63_v20 = vadd.s32 %v60_v18, %v44_v16  ;;  %v64_v21 = vadd.s32 %v61_v19, %v45_v17  ;;  %vm76_vm5 = vcmp.eq.s32.totalorder %v75_v12, %v33_v2  ;;  %vm77_vm6 = vcmp.eq.s32.totalorder %v75_v12, %v34_v7 }
  0x1a   :  { %v79_v22 = vsel %vm76_vm5, 1, %v355_v15  ;;  %v80_v23 = vsel %vm77_vm6, 1, %v355_v15  ;;  %vm95_vm7 = vcmp.eq.s32.totalorder %v94_v13, %v33_v2  ;;  %vm96_vm8 = vcmp.eq.s32.totalorder %v94_v13, %v34_v7  ;;  %p332_p8 = por %p331_p7, %p330_p6 }
  0x1b   :  { %v82_v24 = vadd.s32 %v79_v22, %v63_v20  ;;  %v83_v25 = vadd.s32 %v80_v23, %v64_v21  ;;  %v98_v26 = vsel %vm95_vm7, 1, %v355_v15  ;;  %v99_v27 = vsel %vm96_vm8, 1, %v355_v15 }
  0x1c   :  { %vm43_vm9 = vcmp.eq.s32.totalorder %v40_v10, %v35_v14  ;;  %vm59_vm10 = vcmp.eq.s32.totalorder %v56_v11, %v35_v14  ;;  %vm78_vm11 = vcmp.eq.s32.totalorder %v75_v12, %v35_v14  ;;  %vm97_vm12 = vcmp.eq.s32.totalorder %v94_v13, %v35_v14  ;;  %p333_p9 = pnand %p332_p8, %p326_p5 }
  0x1d   :  { %v101_v28 = vadd.s32 %v98_v26, %v82_v24  ;;  %v102_v29 = vadd.s32 %v99_v27, %v83_v25  ;;  %v46_v30 = vsel %vm43_vm9, 1, %v355_v15  ;;  %v62_v31 = vsel %vm59_vm10, 1, %v355_v15 }
  0x1e   :  { %v65_v32 = vadd.s32 %v62_v31, %v46_v30  ;;  %v81_v33 = vsel %vm78_vm11, 1, %v355_v15  ;;  %v100_v36 = vsel %vm97_vm12, 1, %v355_v15  ;;  %v49_v60 = vstv %s47_s10 }
  0x1f   :  { %v112_v34 = vcvt.s32.f32 %v101_v28  ;;  %v113_v35 = vcvt.s32.f32 %v102_v29  ;;  %v68_v61 = vstv %s262_s11  ;;  %v50_v2 = vmul.f32 %v49_v60, %v48_v57 }
  0x20   :  { %v84_v37 = vadd.s32 %v81_v33, %v65_v32  ;;  %v86_v7 = vcvt.s32.f32 %v398_v5  ;;  %v87_v8 = vstv %s263_s12  ;;  %v106_v4 = vstv %s264_s1 }
  0x21   :  { %v301_v38 = vpack.c.bf16 %v113_v35, %v112_v34  ;;  %v107_v17 = vmul.f32 %v106_v4, %v105_v3  ;;  %v110_v21 = vstv %s458_s3 }
  0x22   :  { %v103_v39 = vadd.s32 %v100_v36, %v84_v37  ;;  %v88_v13 = vmul.f32 %v87_v8, %v86_v7 }
  0x23   :  { %302 = vmatpush3.bf16.msra.mxu0 %v301_v38  ;;  %305 = vmatpush3.bf16.msra.mxu1 %v301_v38 }
  0x24   :  { %283 = vmatprep.subr.mxu0 %v354_v6  ;;  %v114_v40 = vcvt.s32.f32 %v103_v39  ;;  %304 = vmatprep.subr.mxu1 %v354_v6 }
  0x27   :  { %284 = vmatpush3.msk.msra.mxu0 %vm136_vm13, %v114_v40  ;;  %306 = vmatpush3.msk.msra.mxu1 %vm136_vm13, %v114_v40 }
  0x28   :  { %286 = vmatmul.mubr.msk.f32.vlgmr.msra.gmra.mrb[0].mxu0 %vm120_vm14, %v115_v41  ;;  %295 = vmatmul.mubr.msk.f32.vlgmr.msra.gmra.mrb[0].mxu1 %vm120_vm14, %v118_v42 }
  0x29   :  { %288 = vmatprep.mubr.msk.f32.mxu0 %vm353_vm0, %v354_v6  ;;  %297 = vmatprep.mubr.msk.f32.mxu1 %vm353_vm0, %v354_v6 }
  0x2c   :  { %289 = vmatmul.mubr.msk.f32.gmra.mrb[2].mxu0 %vm120_vm14, %v116_v43  ;;  %298 = vmatmul.mubr.msk.f32.gmra.mrb[2].mxu1 %vm120_vm14, %v119_v44 }
  0x2d   :  { %291 = vmatprep.mubr.msk.f32.mxu0 %vm353_vm0, %v354_v6  ;;  %v69_v6 = vmul.f32 %v68_v61, %v67_v58 }
  0x2f   :  { %v70_v12 = vadd.f32 %v69_v6, %v50_v2 }
  0x30   :  { %292 = vmatmul.mubr.msk.f32.gmra.mrb[4].mxu0 %vm120_vm14, %v117_v45 }
  0x31   :  { %v89_v16 = vadd.f32 %v88_v13, %v70_v12 }
  0x33   :  { %v108_v20 = vadd.f32 %v107_v17, %v89_v16 }
  0x35   :  { %v111_v23 = vadd.f32 %v110_v21, %v108_v20 }
  0xfb   :  { %v206_v46 = vpop.f32.mrb[0].mxu0  ;;  %v221_v47 = vpop.f32.mrb[0].mxu1 }
  0xfc   :  { %v287_v48 = vpop.f32.mrb[1].mxu0  ;;  %v296_v49 = vpop.f32.mrb[1].mxu1  ;;  %v230_v52 = vmul.f32 %v206_v46, %v206_v46  ;;  %v233_v0 = vmul.f32 %v221_v47, %v221_v47 }
  0xff   :  { %v211_v50 = vpop.f32.mrb[2].mxu0  ;;  %v226_v51 = vpop.f32.mrb[2].mxu1 }
 0x100   :  { %v231_v53 = vmul.f32 %v211_v50, %v211_v50  ;;  %v290_v54 = vpop.f32.mrb[3].mxu0  ;;  %v299_v55 = vpop.f32.mrb[3].mxu1 }
 0x102   :  { %v234_v56 = vadd.f32 %v231_v53, %v230_v52 }
 0x103   :  { %v216_v59 = vpop.f32.mrb[4].mxu0 }
 0x104   :  { %v232_v62 = vmul.f32 %v216_v59, %v216_v59  ;;  %v293_v63 = vpop.f32.mrb[5].mxu0 }
 0x106   :  { %v235_v1 = vadd.f32 %v234_v56, %v232_v62 }
 0x108   :  { %v236_v10 = vadd.f32 %v235_v1, %v233_v0 }
 0x10a   :  { %v237_v11 = vrot.slane %v236_v10, 4 }
 0x10c   :  { %v238_v14 = vadd.f32 %v237_v11, %v236_v10 }
 0x10e   :  { %v239_v15 = vrot.slane %v238_v14, 2 }
 0x110   :  { %v240_v18 = vadd.f32 %v239_v15, %v238_v14 }
 0x112   :  { %v241_v19 = vrot.slane %v240_v18, 1 }
 0x114   :  { %v242_v5 = vadd.f32 %v241_v19, %v240_v18 }
 0x116   :  { %v243_v22 = vsub.f32 %v242_v5, %v226_v51 }
 0x118   :  { %v244_v24 = vmul.f32 0.5, %v243_v22 }
 0x11a   :  { %v245_v25 = vadd.f32 %v244_v24, %v111_v23 }
 0x11c   :  { %246 = vst [vmem:[#allocation6] sm:$0x1] %v245_v25 }
 0x11d   :  { %336 = shalt.err (!%p333_p9)
}
 0x11e   :  { %s337_s3 = scalar_lea.hbm %s459_s4, 16 }
 0x11f   :  { %p338_p10 = scmp.ne.s32.totalorder %s459_s4, %s337_s3  ;;  %p341_p11 = scmp.lt.u32.totalorder %s337_s3, %s459_s4 }
 0x121   :  { %p343_p12 = pnand %p341_p11, %p338_p10 }
 0x123   :  { %346 = shalt.err (!%p343_p12)
}
 0x124   :  { %256 = dma.vmem_to_hbm [thread:$0]  %s254_s16, 16, %s459_s4, [#allocation4]  }
 0x125   :  { %349 = dma.done.wait [#allocation4], 16  }
 0x126   :  { %350 = vsyncadd [#allocation4], 4294967280 }
 0x127   :  { %260 = vsyncpa [#allocation4], 1 }
 0x128   :  { %261 = vsyncpa [#allocation5], 1 }

</bundles_post_ra>
